<compile_context>
chip_gen: v7x
topology: tpu7x:2x2x1
jax: 0.10.0
libtpu: 0.0.40
codegen_flags: <defaults>
</compile_context>

<pallas_src>
import jax
import jax.numpy as jnp
import numpy as np
from jax.experimental import pallas as pl
from jax.experimental.pallas import tpu as pltpu


def _disc_kernel(x_ref, w1_ref, b1_ref, w2_ref, b2_ref, o_ref):
    # Layer 1: MXU matmul with f32 accumulation; bias + ReLU on the VPU.
    h = jnp.dot(x_ref[...], w1_ref[...], preferred_element_type=jnp.float32)
    h = jnp.maximum(h + b1_ref[...], 0.0)                       # (bm, H) f32

    # Layer 2 (output width 1): VPU multiply + lane reduction instead of a
    # 1-wide MXU matmul.  w2_ref is already a (1, H) row.
    logits = jnp.sum(h * w2_ref[...], axis=-1, keepdims=True)   # (bm, 1) f32
    logits = logits + b2_ref[0]                                 # scalar bias (SMEM)

    o_ref[...] = jax.nn.sigmoid(logits).astype(o_ref.dtype)


def _round_up(n, m):
    return ((n + m - 1) // m) * m


def disc_wrapper_forward(x, w1, b1, w2, b2, *, bm=512):
    """sigmoid(MLP(x)) — Pallas TPU implementation of DiscWrapper.forward.

    x : (B, F), w1 : (F, H), b1 : (1, H) or (H,), w2 : (H, 1), b2 : (1, 1)/(1,)
    Returns (B, 1) float32 probabilities.
    """
    B, F = x.shape
    H = w1.shape[1]
    O = w2.shape[1]
    assert O == 1, "discriminator head is 1-wide"

    b1 = b1.reshape(1, H)
    # Pre-reshape the (H, 1) head weight to a lane-dense (1, H) row so the
    # kernel needs no transpose.
    w2_row = w2.reshape(1, H)
    # Scalar bias lives in SMEM.
    b2_s = jnp.asarray(b2, dtype=jnp.float32).reshape(1)

    # Batch tiling: biggest tile up to `bm` (multiple of 8); pad B to a tile
    # multiple instead of asserting divisibility.
    bm_eff = min(bm, _round_up(B, 8))
    b_pad = _round_up(B, bm_eff)
    if b_pad != B:
        x = jnp.pad(x, ((0, b_pad - B), (0, 0)))

    grid = (b_pad // bm_eff,)

    out = pl.pallas_call(
        _disc_kernel,
        out_shape=jax.ShapeDtypeStruct((b_pad, O), jnp.float32),
        grid_spec=pltpu.PrefetchScalarGridSpec(
            num_scalar_prefetch=0,
            grid=grid,
            in_specs=[
                pl.BlockSpec((bm_eff, F), lambda i: (i, 0)),    # x tile
                pl.BlockSpec((F, H), lambda i: (0, 0)),         # W1 (resident)
                pl.BlockSpec((1, H), lambda i: (0, 0)),         # b1
                pl.BlockSpec((1, H), lambda i: (0, 0)),         # w2 row
                pl.BlockSpec(memory_space=pltpu.MemorySpace.SMEM),  # b2 scalar
            ],
            out_specs=pl.BlockSpec((bm_eff, O), lambda i: (i, 0)),
        ),
        compiler_params=pltpu.CompilerParams(
            dimension_semantics=("parallel",),      # v7x: shard batch over 2 TCs
            vmem_limit_bytes=32 * 1024 * 1024,      # raise v5e's 16 MiB default
        ),
    )(x, w1, b1, w2_row, b2_s)

    return out[:B]


def _reference(x, w1, b1, w2, b2):
    h = jnp.maximum(x @ w1 + b1.reshape(1, -1), 0.0)
    return jax.nn.sigmoid(h @ w2 + jnp.asarray(b2).reshape(1, 1))


if __name__ == "__main__":
    # Small shapes consistent with a tabular discriminator.
    B, F, H, O = 64, 16, 32, 1

    key = jax.random.PRNGKey(0)
    kx, k1, k2, k3, k4 = jax.random.split(key, 5)

    x = jax.random.normal(kx, (B, F), dtype=jnp.float32)
    w1 = jax.random.normal(k1, (F, H), dtype=jnp.float32) * 0.1
    b1 = jax.random.normal(k2, (1, H), dtype=jnp.float32) * 0.1
    w2 = jax.random.normal(k3, (H, O), dtype=jnp.float32) * 0.1
    b2 = jax.random.normal(k4, (1, O), dtype=jnp.float32) * 0.1

    y = disc_wrapper_forward(x, w1, b1, w2, b2)
    y = jax.block_until_ready(y)

    y_ref = _reference(x, w1, b1, w2, b2)
    np.testing.assert_allclose(np.asarray(y), np.asarray(y_ref),
                               rtol=1e-5, atol=1e-5)

    print("KERNEL_OK")
</pallas_src>

<mosaic_0001>
module attributes {stable_mosaic.version = 11 : i64} {
  func.func @_disc_kernel(%arg0: i32, %arg1: memref<64x16xf32, #tpu.memory_space<vmem>>, %arg2: memref<16x32xf32, #tpu.memory_space<vmem>>, %arg3: memref<1x32xf32, #tpu.memory_space<vmem>>, %arg4: memref<1x32xf32, #tpu.memory_space<vmem>>, %arg5: memref<1xf32, #tpu.memory_space<smem>>, %arg6: memref<64x1xf32, #tpu.memory_space<vmem>>) attributes {dimension_semantics = [#tpu.dimension_semantics<parallel>], iteration_bounds = array<i64: 1>, scalar_prefetch = 0 : i64, scratch_operands = 0 : i64, tpu.core_type = #tpu.core_type<tc>, window_params = [{transform_indices = @transform_0, window_bounds = array<i64: 64, 16>}, {pipeline_mode = #tpu.pipeline_mode<synchronous>, transform_indices = @transform_1, window_bounds = array<i64: 16, 32>}, {pipeline_mode = #tpu.pipeline_mode<synchronous>, transform_indices = @transform_2, window_bounds = array<i64: 1, 32>}, {pipeline_mode = #tpu.pipeline_mode<synchronous>, transform_indices = @transform_3, window_bounds = array<i64: 1, 32>}, {transform_indices = @transform_4, window_bounds = array<i64: 1>}, {transform_indices = @transform_5, window_bounds = array<i64: 64, 1>}]} {
    %c0 = arith.constant 0 : index
    %c0_0 = arith.constant 0 : index
    %0 = vector.load %arg1[%c0, %c0_0] : memref<64x16xf32, #tpu.memory_space<vmem>>, vector<64x16xf32>
    %c0_1 = arith.constant 0 : index
    %c0_2 = arith.constant 0 : index
    %1 = vector.load %arg2[%c0_1, %c0_2] : memref<16x32xf32, #tpu.memory_space<vmem>>, vector<16x32xf32>
    %cst = arith.constant dense<0.000000e+00> : vector<64x32xf32>
    %2 = tpu.matmul %0, %1, %cst {dimension_numbers = #tpu.dot_dimension_numbers<[1], [0], [0], [1], [0, 0, 1, 1], [], []>} : vector<64x16xf32>, vector<16x32xf32>, vector<64x32xf32> -> vector<64x32xf32>
    %c0_3 = arith.constant 0 : index
    %c0_4 = arith.constant 0 : index
    %3 = vector.load %arg3[%c0_3, %c0_4] : memref<1x32xf32, #tpu.memory_space<vmem>>, vector<1x32xf32>
    %4 = vector.broadcast %3 : vector<1x32xf32> to vector<64x32xf32>
    %5 = arith.addf %2, %4 : vector<64x32xf32>
    %cst_5 = arith.constant 0.000000e+00 : f32
    %6 = vector.broadcast %cst_5 : f32 to vector<64x32xf32>
    %7 = arith.maximumf %5, %6 : vector<64x32xf32>
    %c0_6 = arith.constant 0 : index
    %c0_7 = arith.constant 0 : index
    %8 = vector.load %arg4[%c0_6, %c0_7] : memref<1x32xf32, #tpu.memory_space<vmem>>, vector<1x32xf32>
    %9 = vector.broadcast %8 : vector<1x32xf32> to vector<64x32xf32>
    %10 = arith.mulf %7, %9 : vector<64x32xf32>
    %cst_8 = arith.constant dense<0.000000e+00> : vector<64xf32>
    %11 = vector.multi_reduction <add>, %10, %cst_8 [1] : vector<64x32xf32> to vector<64xf32>
    %12 = vector.shape_cast %11 : vector<64xf32> to vector<64x1xf32>
    %c0_9 = arith.constant 0 : index
    %13 = memref.load %arg5[%c0_9] : memref<1xf32, #tpu.memory_space<smem>>
    %14 = vector.broadcast %13 : f32 to vector<64x1xf32>
    %15 = arith.addf %12, %14 : vector<64x1xf32>
    %16 = arith.negf %15 : vector<64x1xf32>
    %17 = math.exp %16 : vector<64x1xf32>
    %cst_10 = arith.constant 1.000000e+00 : f32
    %18 = vector.broadcast %cst_10 : f32 to vector<64x1xf32>
    %19 = arith.addf %18, %17 : vector<64x1xf32>
    %20 = arith.divf %18, %19 : vector<64x1xf32>
    %c0_11 = arith.constant 0 : index
    %c0_12 = arith.constant 0 : index
    %21 = vector.load %arg6[%c0_11, %c0_12] : memref<64x1xf32, #tpu.memory_space<vmem>>, vector<64x1xf32>
    tpu.vector_store %arg6[%c0_11, %c0_12], %20 {strides = array<i32>} : memref<64x1xf32, #tpu.memory_space<vmem>>, vector<64x1xf32>,
    return
  }
  func.func @transform_0(%arg0: i32) -> (i32, i32) {
    %c0_i32 = arith.constant 0 : i32
    %c0_i32_0 = arith.constant 0 : i32
    return %arg0, %c0_i32 : i32, i32
  }
  func.func @transform_1(%arg0: i32) -> (i32, i32) {
    %c0_i32 = arith.constant 0 : i32
    %c0_i32_0 = arith.constant 0 : i32
    %c0_i32_1 = arith.constant 0 : i32
    return %c0_i32, %c0_i32_0 : i32, i32
  }
  func.func @transform_2(%arg0: i32) -> (i32, i32) {
    %c0_i32 = arith.constant 0 : i32
    %c0_i32_0 = arith.constant 0 : i32
    %c0_i32_1 = arith.constant 0 : i32
    return %c0_i32, %c0_i32_0 : i32, i32
  }
  func.func @transform_3(%arg0: i32) -> (i32, i32) {
    %c0_i32 = arith.constant 0 : i32
    %c0_i32_0 = arith.constant 0 : i32
    %c0_i32_1 = arith.constant 0 : i32
    return %c0_i32, %c0_i32_0 : i32, i32
  }
  func.func @transform_4(%arg0: i32) -> i32 {
    %c0_i32 = arith.constant 0 : i32
    %c0_i32_0 = arith.constant 0 : i32
    return %c0_i32 : i32
  }
  func.func @transform_5(%arg0: i32) -> (i32, i32) {
    %c0_i32 = arith.constant 0 : i32
    %c0_i32_0 = arith.constant 0 : i32
    return %arg0, %c0_i32 : i32, i32
  }
}

</mosaic_0001>

<bundles_post_ra>
// kernel: tpu_custom_call.1
= control target key start
LH: loop header
LB: loop body
LE: loop exit
PB: predicated region body
PF: predicated region fallthrough
CT: control target
= control target key end

     0   :  { %vm38_vm0 = vcmask 130048   ;;  %vm191_vm1 = vcmask 261120   ;;  %vm274_vm2 = vcmask 7168   ;;  %s486_s1 = inlined_call_operand.vmem [shape: f32[16,32], index: 1, kind: input, shape index: {}]   ;;  %s487_s0 = inlined_call_operand.vmem [shape: f32[64,16], index: 0, kind: input, shape index: {}]   ;;  %s488_s2 = inlined_call_operand.vmem [shape: f32[1,32], index: 2, kind: input, shape index: {}]   ;;  %s489_s3 = inlined_call_operand.vmem [shape: f32[1,32], index: 3, kind: input, shape index: {}]   ;;  %s490_s4 = inlined_call_operand.<no memory space> [shape: f32[1], index: 4, kind: input, shape index: {}]   ;;  %s491_s5 = inlined_call_operand.vmem [shape: f32[64,1], index: 5, kind: output, shape index: {}]  }
   0x1   :  { %v29_v0 = vld [vmem:[%s486_s1] sm:$0xff]  ;;  %v30_v1 = vld [vmem:[%s486_s1 + $0x8] sm:$0xff]  ;;  %v23_v7 = vld [vmem:[%s487_s0 + $0x10] sm:$0xff]  ;;  %v217_v53 = vstv %s490_s4 }
   0x2   :  { %v21_v2 = vld [vmem:[%s487_s0] sm:$0xff]  ;;  %v331_v3 = vpack.c.bf16 %v30_v1, %v29_v0  ;;  %v22_v5 = vld [vmem:[%s487_s0 + $0x8] sm:$0xff]  ;;  %v27_v8 = vld [vmem:[%s487_s0 + $0x30] sm:$0xff] }
   0x3   :  { %319 = vmatprep.mubr.msk.f32.mxu0 %vm38_vm0, %v21_v2  ;;  %v25_v4 = vld [vmem:[%s487_s0 + $0x20] sm:$0xff]  ;;  %v26_v6 = vld [vmem:[%s487_s0 + $0x28] sm:$0xff]  ;;  %v24_v9 = vld [vmem:[%s487_s0 + $0x18] sm:$0xff] }
   0x4   :  { %325 = vmatprep.mubr.msk.f32.mxu1 %vm38_vm0, %v25_v4  ;;  %332 = vmatprep.subr.bf16.mxu0 %v331_v3  ;;  %v28_v10 = vld [vmem:[%s487_s0 + $0x38] sm:$0xff]  ;;  %v287_v11 = vld [vmem:[%s488_s2] ss:$0 sm:$0xff] }
   0x5   :  { %335 = vmatprep.subr.bf16.mxu1 %v331_v3  ;;  %334 = vmatpush3.bf16.msra.mxu0 %v331_v3  ;;  %v296_v20 = vld [vmem:[%s489_s3] ss:$0 sm:$0xff] }
   0x6   :  { %336 = vmatpush3.bf16.msra.mxu1 %v331_v3 }
   0x8   :  { %320 = vmatmul.mubr.msk.f32.vlgmr.msra.gmra.mrb[0].mxu0 %vm38_vm0, %v22_v5 }
   0x9   :  { %326 = vmatmul.mubr.msk.f32.vlgmr.msra.gmra.mrb[0].mxu1 %vm38_vm0, %v26_v6  ;;  %322 = vmatprep.mubr.msk.f32.mxu0 %vm38_vm0, %v23_v7 }
   0xa   :  { %328 = vmatprep.mubr.msk.f32.mxu1 %vm38_vm0, %v27_v8 }
   0xc   :  { %323 = vmatmul.mubr.msk.f32.gmra.mrb[2].mxu0 %vm38_vm0, %v24_v9 }
   0xd   :  { %329 = vmatmul.mubr.msk.f32.gmra.mrb[2].mxu1 %vm38_vm0, %v28_v10 }
  0xdb   :  { %v321_v12 = vpop.f32.mrb[0].mxu0 }
  0xdc   :  { %v327_v13 = vpop.f32.mrb[0].mxu1  ;;  %v135_v14 = vadd.f32 %v321_v12, %v287_v11  ;;  %v129_v16 = vpop.f32.mrb[1].mxu0 }
  0xdd   :  { %v155_v15 = vadd.f32 %v327_v13, %v287_v11  ;;  %v149_v17 = vpop.f32.mrb[1].mxu1  ;;  %v130_v18 = vadd.f32 %v287_v11, %v129_v16 }
  0xde   :  { %v150_v19 = vadd.f32 %v287_v11, %v149_v17  ;;  %v169_v21 = vmax.f32 %v135_v14, 0.0 }
  0xdf   :  { %v173_v22 = vmax.f32 %v155_v15, 0.0  ;;  %v168_v23 = vmax.f32 %v130_v18, 0.0  ;;  %v324_v24 = vpop.f32.mrb[2].mxu0 }
  0xe0   :  { %v330_v25 = vpop.f32.mrb[2].mxu1  ;;  %v145_v26 = vadd.f32 %v324_v24, %v287_v11  ;;  %v139_v27 = vpop.f32.mrb[3].mxu0  ;;  %v184_v29 = vmul.f32 %v296_v20, %v169_v21  ;;  %v172_v32 = vmax.f32 %v150_v19, 0.0 }
  0xe1   :  { %v188_v28 = vmul.f32 %v296_v20, %v173_v22  ;;  %v165_v30 = vadd.f32 %v330_v25, %v287_v11  ;;  %v159_v31 = vpop.f32.mrb[3].mxu1  ;;  %v140_v33 = vadd.f32 %v287_v11, %v139_v27  ;;  %v183_v38 = vmul.f32 %v296_v20, %v168_v23 }
  0xe2   :  { %v160_v34 = vadd.f32 %v287_v11, %v159_v31  ;;  %v171_v35 = vmax.f32 %v145_v26, 0.0  ;;  %v195_v37 = vsel %vm191_vm1, %v184_v29, 0.0  ;;  %v187_v46 = vmul.f32 %v296_v20, %v172_v32 }
  0xe3   :  { %v207_v36 = vsel %vm191_vm1, %v188_v28, 0.0  ;;  %v170_v39 = vmax.f32 %v140_v33, 0.0  ;;  %196 = vadd.xlane.f32.xlu0 %v195_v37  ;;  %v175_v40 = vmax.f32 %v165_v30, 0.0  ;;  %v192_v44 = vsel %vm191_vm1, %v183_v38, 0.0 }
  0xe4   :  { %208 = vadd.xlane.f32.xlu1 %v207_v36  ;;  %v174_v41 = vmax.f32 %v160_v34, 0.0  ;;  %v186_v42 = vmul.f32 %v296_v20, %v171_v35  ;;  %v204_v50 = vsel %vm191_vm1, %v187_v46, 0.0 }
  0xe5   :  { %v185_v45 = vmul.f32 %v296_v20, %v170_v39  ;;  %v190_v47 = vmul.f32 %v296_v20, %v175_v40 }
  0xe6   :  { %v201_v43 = vsel %vm191_vm1, %v186_v42, 0.0  ;;  %v189_v48 = vmul.f32 %v296_v20, %v174_v41 }
  0xe7   :  { %193 = vadd.xlane.f32.xlu0 %v192_v44  ;;  %v198_v49 = vsel %vm191_vm1, %v185_v45, 0.0  ;;  %v213_v51 = vsel %vm191_vm1, %v190_v47, 0.0 }
  0xe8   :  { %202 = vadd.xlane.f32.xlu1 %v201_v43  ;;  %v210_v52 = vsel %vm191_vm1, %v189_v48, 0.0 }
  0xeb   :  { %205 = vadd.xlane.f32.xlu0 %v204_v50 }
  0xec   :  { %199 = vadd.xlane.f32.xlu1 %v198_v49 }
  0xef   :  { %211 = vadd.xlane.f32.xlu0 %v210_v52 }
  0xf0   :  { %214 = vadd.xlane.f32.xlu1 %v213_v51 }
 0x170   :  { %v197_v55 = vpop.xlane.xlu0 %196 }
 0x171   :  { %v209_v54 = vpop.xlane.xlu1 %208  ;;  %v219_v57 = vadd.f32 %v217_v53, %v197_v55 }
 0x172   :  { %v223_v56 = vadd.f32 %v217_v53, %v209_v54 }
 0x173   :  { %v298_v59 = vmul.f32 -1.442695, %v219_v57 }
 0x174   :  { %v302_v58 = vmul.f32 -1.442695, %v223_v56  ;;  %v194_v61 = vpop.xlane.xlu0 %193 }
 0x175   :  { %v203_v60 = vpop.xlane.xlu1 %202  ;;  %v218_v63 = vadd.f32 %v217_v53, %v194_v61 }
 0x176   :  { %337 = vpow2.f32 %v302_v58  ;;  %v221_v62 = vadd.f32 %v217_v53, %v203_v60 }
 0x177   :  { %339 = vpow2.f32 %v298_v59  ;;  %v297_v1 = vmul.f32 -1.442695, %v218_v63 }
 0x178   :  { %v300_v0 = vmul.f32 -1.442695, %v221_v62  ;;  %v206_v3 = vpop.xlane.xlu0 %205 }
 0x179   :  { %v200_v2 = vpop.xlane.xlu1 %199  ;;  %v222_v5 = vadd.f32 %v217_v53, %v206_v3 }
 0x17a   :  { %341 = vpow2.f32 %v300_v0  ;;  %v220_v4 = vadd.f32 %v217_v53, %v200_v2 }
 0x17b   :  { %343 = vpow2.f32 %v297_v1  ;;  %v301_v7 = vmul.f32 -1.442695, %v222_v5 }
 0x17c   :  { %v299_v6 = vmul.f32 -1.442695, %v220_v4  ;;  %v212_v9 = vpop.xlane.xlu0 %211 }
 0x17d   :  { %v215_v8 = vpop.xlane.xlu1 %214  ;;  %v224_v11 = vadd.f32 %v217_v53, %v212_v9 }
 0x17e   :  { %345 = vpow2.f32 %v299_v6  ;;  %v225_v10 = vadd.f32 %v217_v53, %v215_v8 }
 0x17f   :  { %347 = vpow2.f32 %v301_v7  ;;  %v303_v16 = vmul.f32 -1.442695, %v224_v11 }
 0x180   :  { %v338_v12 = vpop.eup %337  ;;  %v304_v13 = vmul.f32 -1.442695, %v225_v10 }
 0x181   :  { %v340_v14 = vpop.eup %339  ;;  %v255_v15 = vadd.f32 1.0, %v338_v12 }
 0x182   :  { %v251_v17 = vadd.f32 1.0, %v340_v14  ;;  %349 = vpow2.f32 %v304_v13 }
 0x183   :  { %351 = vrcp.f32 %v255_v15 }
 0x184   :  { %v342_v18 = vpop.eup %341  ;;  %353 = vrcp.f32 %v251_v17 }
 0x185   :  { %v344_v19 = vpop.eup %343  ;;  %v253_v20 = vadd.f32 1.0, %v342_v18  ;;  %355 = vpow2.f32 %v303_v16 }
 0x186   :  { %v250_v21 = vadd.f32 1.0, %v344_v19 }
 0x187   :  { %357 = vrcp.f32 %v253_v20 }
 0x188   :  { %v346_v22 = vpop.eup %345  ;;  %359 = vrcp.f32 %v250_v21 }
 0x189   :  { %v348_v23 = vpop.eup %347  ;;  %v252_v24 = vadd.f32 1.0, %v346_v22 }
 0x18a   :  { %v254_v25 = vadd.f32 1.0, %v348_v23 }
 0x18b   :  { %361 = vrcp.f32 %v252_v24 }
 0x18c   :  { %v350_v26 = vpop.eup %349  ;;  %363 = vrcp.f32 %v254_v25 }
 0x18d   :  { %v352_v27 = vpop.eup %351  ;;  %v257_v28 = vadd.f32 1.0, %v350_v26 }
 0x18e   :  { %v354_v29 = vpop.eup %353  ;;  %280 = vst.msk [vmem:[%s491_s5 + $0x28] sm:$0xff] %vm274_vm2, %v352_v27 }
 0x18f   :  { %v356_v30 = vpop.eup %355  ;;  %276 = vst.msk [vmem:[%s491_s5 + $0x8] sm:$0xff] %vm274_vm2, %v354_v29  ;;  %365 = vrcp.f32 %v257_v28 }
 0x190   :  { %v256_v31 = vadd.f32 1.0, %v356_v30 }
 0x191   :  { %v358_v32 = vpop.eup %357 }
 0x192   :  { %v360_v33 = vpop.eup %359  ;;  %278 = vst.msk [vmem:[%s491_s5 + $0x18] sm:$0xff] %vm274_vm2, %v358_v32  ;;  %367 = vrcp.f32 %v256_v31 }
 0x193   :  { %275 = vst.msk [vmem:[%s491_s5] sm:$0xff] %vm274_vm2, %v360_v33 }
 0x195   :  { %v362_v34 = vpop.eup %361 }
 0x196   :  { %v364_v35 = vpop.eup %363  ;;  %277 = vst.msk [vmem:[%s491_s5 + $0x10] sm:$0xff] %vm274_vm2, %v362_v34 }
 0x197   :  { %279 = vst.msk [vmem:[%s491_s5 + $0x20] sm:$0xff] %vm274_vm2, %v364_v35 }
 0x199   :  { %v366_v36 = vpop.eup %365 }
 0x19a   :  { %282 = vst.msk [vmem:[%s491_s5 + $0x38] sm:$0xff] %vm274_vm2, %v366_v36 }
 0x19c   :  { %v368_v37 = vpop.eup %367 }
 0x19d   :  { %281 = vst.msk [vmem:[%s491_s5 + $0x30] sm:$0xff] %vm274_vm2, %v368_v37 }

</bundles_post_ra>
